<compile_context>
chip_gen: v7x
topology: tpu7x:2x2x1
jax: 0.10.0
libtpu: 0.0.40
codegen_flags: <defaults>
</compile_context>

<pallas_src>
import functools

import jax
import jax.numpy as jnp
from jax.experimental import pallas as pl
from jax.experimental.pallas import tpu as pltpu


def _adaptive_ln_kernel(x_ref, gamma_ref, beta_ref, o_ref, *, eps, valid_s):
    # x_ref block: (tR, S_pad); gamma_ref / beta_ref: (1, S_pad) (resident).
    x = x_ref[...].astype(jnp.float32)                     # (tR, S_pad)
    g = gamma_ref[...].astype(jnp.float32)                 # (1, S_pad)
    b = beta_ref[...].astype(jnp.float32)                  # (1, S_pad)

    s_pad = x.shape[-1]
    padded = valid_s != s_pad
    if padded:
        lane = jax.lax.broadcasted_iota(jnp.int32, x.shape, 1)
        mask = lane < valid_s
        xs = jnp.where(mask, x, jnp.float32(0.0))
    else:
        xs = x

    mean = jnp.sum(xs, axis=-1, keepdims=True) * jnp.float32(1.0 / valid_s)

    # torch.std default is unbiased (correction = 1).
    d = x - mean
    if padded:
        d = jnp.where(mask, d, jnp.float32(0.0))
    var = jnp.sum(d * d, axis=-1, keepdims=True) * jnp.float32(1.0 / (valid_s - 1))
    std = jnp.sqrt(var)

    # Per-row exact reciprocal (tR divides total) instead of tR*S divisions;
    # eps is added to std — do NOT fold into rsqrt(var + eps), numerics differ.
    inv = jnp.float32(1.0) / (std + jnp.float32(eps))      # (tR, 1)

    # Recompute (x - mean) for the output pass instead of reusing the masked
    # `d`, so no block-sized f32 temporary must stay live across the reduction
    # (frees VMEM for bigger tiles); the extra subtract is free VALU filler.
    o_ref[...] = ((x - mean) * (inv * g) + b).astype(o_ref.dtype)


def _tpu_budgets():
    """(max_block_bytes, vmem_limit_bytes), generation-aware.

    64 MiB VMEM parts (v7x): 4 MiB blocks, 48 MiB scoped limit.
    128 MiB VMEM parts (v5e/v6e): 8 MiB blocks, 96 MiB scoped limit.
    Unknown: conservative (v7x) numbers.
    """
    vmem = None
    try:
        info = pltpu.get_tpu_info()
        for name in ("vmem_capacity_bytes", "vmem_size_bytes", "vmem_bytes"):
            v = getattr(info, name, None)
            if isinstance(v, int) and v > 0:
                vmem = v
                break
    except Exception:
        vmem = None
    if vmem is None or vmem <= 64 * 1024 * 1024:
        return 4 << 20, 48 * 1024 * 1024
    return 8 << 20, 96 * 1024 * 1024


def _pick_rows_per_block(rows, row_bytes, itemsize, max_block_bytes):
    """Pick a sublane-aligned row tile.

    * dtype-aware alignment: one full sublane tile = 32 bytes / itemsize rows
      (8 for f32, 16 for bf16, 32 for int8/fp8);
    * block bytes capped by the generation-aware budget;
    * force >= 2 (preferably >= 4) grid steps with an EVEN count and an exact
      divisor of `rows`, so v7x's 2 TensorCores split evenly, the pipeline has
      something to double-buffer, and there is no masked tail block.
    """
    align = max(8, 32 // max(1, itemsize))
    if rows <= align:
        return rows                                   # too small to split

    cap = max(align, (max_block_bytes // max(1, row_bytes)) // align * align)
    target_steps = 4 if rows >= 4 * align else 2
    cap = min(cap, max(align, (rows // target_steps) // align * align))

    fallback_divisor = None
    r = cap
    while r >= align:
        if rows % r == 0:
            if (rows // r) % 2 == 0:
                return r                              # exact divisor, even steps
            if fallback_divisor is None:
                fallback_divisor = r                  # exact divisor, odd steps
        r -= align
    if fallback_divisor is not None:
        return fallback_divisor
    return cap                                        # masked tail as a last resort


def adaptive_layer_norm(x, gamma, beta, eps=1e-5):
    """x: (B, F, S); gamma, beta: (F,) — broadcast along the last axis (PyTorch semantics)."""
    B, F, S = x.shape
    assert gamma.shape == (F,) and beta.shape == (F,)
    assert S == F, "PyTorch broadcasting of gamma (F,) against (B,F,S) requires S == F"
    assert S >= 2, "unbiased std (correction=1) requires seq_len >= 2"

    rows = B * F
    x2 = x.reshape(rows, S)              # free reshape: layout plumbing only
    g2 = gamma.reshape(1, S)             # F == S, broadcasts along lanes
    b2 = beta.reshape(1, S)

    # Keep the lane axis dense: pad S up to a multiple of 128 in the wrapper
    # and mask the padded lanes out of mean/var inside the kernel.
    S_pad = ((S + 127) // 128) * 128
    if S_pad != S:
        pad = S_pad - S
        x2 = jnp.pad(x2, ((0, 0), (0, pad)))
        g2 = jnp.pad(g2, ((0, 0), (0, pad)))
        b2 = jnp.pad(b2, ((0, 0), (0, pad)))

    max_block_bytes, vmem_limit = _tpu_budgets()
    itemsize = x.dtype.itemsize
    t_rows = _pick_rows_per_block(rows, S_pad * itemsize, itemsize, max_block_bytes)
    grid = (pl.cdiv(rows, t_rows),)

    kernel = functools.partial(_adaptive_ln_kernel, eps=eps, valid_s=S)

    out2 = pl.pallas_call(
        kernel,
        out_shape=jax.ShapeDtypeStruct((rows, S_pad), x.dtype),
        grid_spec=pltpu.PrefetchScalarGridSpec(
            num_scalar_prefetch=0,
            grid=grid,
            in_specs=[
                pl.BlockSpec((t_rows, S_pad), lambda i: (i, 0)),
                pl.BlockSpec((1, S_pad), lambda i: (0, 0)),   # resident across steps
                pl.BlockSpec((1, S_pad), lambda i: (0, 0)),   # resident across steps
            ],
            out_specs=pl.BlockSpec((t_rows, S_pad), lambda i: (i, 0)),
        ),
        compiler_params=pltpu.CompilerParams(
            dimension_semantics=("parallel",),                # 2-TC sharding on v7x
            vmem_limit_bytes=vmem_limit,
        ),
    )(x2, g2, b2)

    if S_pad != S:
        out2 = out2[:, :S]
    return out2.reshape(B, F, S)


def _reference(x, gamma, beta, eps=1e-5):
    xf = x.astype(jnp.float32)
    mean = jnp.mean(xf, axis=-1, keepdims=True)
    var = jnp.sum((xf - mean) ** 2, axis=-1, keepdims=True) / (x.shape[-1] - 1)
    std = jnp.sqrt(var)
    return (gamma.astype(jnp.float32) * (xf - mean) / (std + eps)
            + beta.astype(jnp.float32)).astype(x.dtype)


def _make_inputs(key, B, F, S, dtype):
    kx, kg, kb = jax.random.split(key, 3)
    x = jax.random.normal(kx, (B, F, S), dtype=jnp.float32).astype(dtype)
    gamma = (jnp.ones((F,), jnp.float32)
             + 0.1 * jax.random.normal(kg, (F,), jnp.float32)).astype(dtype)
    beta = (0.05 * jax.random.normal(kb, (F,), jnp.float32)).astype(dtype)
    return x, gamma, beta


if __name__ == "__main__":
    key = jax.random.PRNGKey(0)
    k1, k2, k3 = jax.random.split(key, 3)

    # Case 1: f32, lane-dense F = S = 128, multiple even grid steps.
    B, F, S = 4, 128, 128
    x, gamma, beta = _make_inputs(k1, B, F, S, jnp.float32)
    y = jax.block_until_ready(adaptive_layer_norm(x, gamma, beta, eps=1e-5))
    y_ref = _reference(x, gamma, beta, eps=1e-5)
    assert y.shape == (B, F, S)
    assert jnp.allclose(y, y_ref, atol=1e-5, rtol=1e-5), "f32 / 128-lane mismatch"

    # Case 2: f32, S not a multiple of 128 (exercises the lane-padding path).
    B, F, S = 2, 96, 96
    x, gamma, beta = _make_inputs(k2, B, F, S, jnp.float32)
    y = jax.block_until_ready(adaptive_layer_norm(x, gamma, beta, eps=1e-5))
    y_ref = _reference(x, gamma, beta, eps=1e-5)
    assert y.shape == (B, F, S)
    assert jnp.allclose(y, y_ref, atol=1e-5, rtol=1e-5), "f32 / padded-lane mismatch"

    # Case 3: bf16 (exercises the dtype-aware sublane alignment).
    B, F, S = 2, 128, 128
    x, gamma, beta = _make_inputs(k3, B, F, S, jnp.bfloat16)
    y = jax.block_until_ready(adaptive_layer_norm(x, gamma, beta, eps=1e-5))
    y_ref = _reference(x, gamma, beta, eps=1e-5)
    assert y.shape == (B, F, S)
    assert jnp.allclose(y.astype(jnp.float32), y_ref.astype(jnp.float32),
                        atol=2e-2, rtol=2e-2), "bf16 mismatch"

    print("KERNEL_OK")
</pallas_src>

<mosaic_0001>
module attributes {stable_mosaic.version = 11 : i64} {
  func.func @_adaptive_ln_kernel(%arg0: i32, %arg1: memref<128x128xf32, #tpu.memory_space<vmem>>, %arg2: memref<1x128xf32, #tpu.memory_space<vmem>>, %arg3: memref<1x128xf32, #tpu.memory_space<vmem>>, %arg4: memref<128x128xf32, #tpu.memory_space<vmem>>) attributes {dimension_semantics = [#tpu.dimension_semantics<parallel>], iteration_bounds = array<i64: 4>, scalar_prefetch = 0 : i64, scratch_operands = 0 : i64, tpu.core_type = #tpu.core_type<tc>, window_params = [{transform_indices = @transform_0, window_bounds = array<i64: 128, 128>}, {pipeline_mode = #tpu.pipeline_mode<synchronous>, transform_indices = @transform_1, window_bounds = array<i64: 1, 128>}, {pipeline_mode = #tpu.pipeline_mode<synchronous>, transform_indices = @transform_2, window_bounds = array<i64: 1, 128>}, {transform_indices = @transform_3, window_bounds = array<i64: 128, 128>}]} {
    %c0 = arith.constant 0 : index
    %c0_0 = arith.constant 0 : index
    %0 = vector.load %arg1[%c0, %c0_0] : memref<128x128xf32, #tpu.memory_space<vmem>>, vector<128x128xf32>
    %c0_1 = arith.constant 0 : index
    %c0_2 = arith.constant 0 : index
    %1 = vector.load %arg2[%c0_1, %c0_2] : memref<1x128xf32, #tpu.memory_space<vmem>>, vector<1x128xf32>
    %c0_3 = arith.constant 0 : index
    %c0_4 = arith.constant 0 : index
    %2 = vector.load %arg3[%c0_3, %c0_4] : memref<1x128xf32, #tpu.memory_space<vmem>>, vector<1x128xf32>
    %cst = arith.constant dense<0.000000e+00> : vector<128xf32>
    %3 = vector.multi_reduction <add>, %0, %cst [1] : vector<128x128xf32> to vector<128xf32>
    %4 = vector.shape_cast %3 : vector<128xf32> to vector<128x1xf32>
    %cst_5 = arith.constant 7.812500e-03 : f32
    %5 = vector.broadcast %cst_5 : f32 to vector<128x1xf32>
    %6 = arith.mulf %4, %5 : vector<128x1xf32>
    %7 = vector.broadcast %6 : vector<128x1xf32> to vector<128x128xf32>
    %8 = arith.subf %0, %7 : vector<128x128xf32>
    %9 = arith.mulf %8, %8 : vector<128x128xf32>
    %cst_6 = arith.constant dense<0.000000e+00> : vector<128xf32>
    %10 = vector.multi_reduction <add>, %9, %cst_6 [1] : vector<128x128xf32> to vector<128xf32>
    %11 = vector.shape_cast %10 : vector<128xf32> to vector<128x1xf32>
    %cst_7 = arith.constant 0.00787401571 : f32
    %12 = vector.broadcast %cst_7 : f32 to vector<128x1xf32>
    %13 = arith.mulf %11, %12 : vector<128x1xf32>
    %14 = math.sqrt %13 : vector<128x1xf32>
    %cst_8 = arith.constant 9.99999974E-6 : f32
    %15 = vector.broadcast %cst_8 : f32 to vector<128x1xf32>
    %16 = arith.addf %14, %15 : vector<128x1xf32>
    %cst_9 = arith.constant 1.000000e+00 : f32
    %17 = vector.broadcast %cst_9 : f32 to vector<128x1xf32>
    %18 = arith.divf %17, %16 : vector<128x1xf32>
    %19 = vector.broadcast %6 : vector<128x1xf32> to vector<128x128xf32>
    %20 = arith.subf %0, %19 : vector<128x128xf32>
    %21 = vector.broadcast %18 : vector<128x1xf32> to vector<128x128xf32>
    %22 = vector.broadcast %1 : vector<1x128xf32> to vector<128x128xf32>
    %23 = arith.mulf %21, %22 : vector<128x128xf32>
    %24 = arith.mulf %20, %23 : vector<128x128xf32>
    %25 = vector.broadcast %2 : vector<1x128xf32> to vector<128x128xf32>
    %26 = arith.addf %24, %25 : vector<128x128xf32>
    %c0_10 = arith.constant 0 : index
    %c0_11 = arith.constant 0 : index
    %27 = vector.load %arg4[%c0_10, %c0_11] : memref<128x128xf32, #tpu.memory_space<vmem>>, vector<128x128xf32>
    tpu.vector_store %arg4[%c0_10, %c0_11], %26 {strides = array<i32>} : memref<128x128xf32, #tpu.memory_space<vmem>>, vector<128x128xf32>,
    return
  }
  func.func @transform_0(%arg0: i32) -> (i32, i32) {
    %c0_i32 = arith.constant 0 : i32
    %c0_i32_0 = arith.constant 0 : i32
    return %arg0, %c0_i32 : i32, i32
  }
  func.func @transform_1(%arg0: i32) -> (i32, i32) {
    %c0_i32 = arith.constant 0 : i32
    %c0_i32_0 = arith.constant 0 : i32
    %c0_i32_1 = arith.constant 0 : i32
    return %c0_i32, %c0_i32_0 : i32, i32
  }
  func.func @transform_2(%arg0: i32) -> (i32, i32) {
    %c0_i32 = arith.constant 0 : i32
    %c0_i32_0 = arith.constant 0 : i32
    %c0_i32_1 = arith.constant 0 : i32
    return %c0_i32, %c0_i32_0 : i32, i32
  }
  func.func @transform_3(%arg0: i32) -> (i32, i32) {
    %c0_i32 = arith.constant 0 : i32
    %c0_i32_0 = arith.constant 0 : i32
    return %arg0, %c0_i32 : i32, i32
  }
}

</mosaic_0001>

<bundles_post_ra>
// kernel: tpu_custom_call.1
= control target key start
LH: loop header
LB: loop body
LE: loop exit
PB: predicated region body
PF: predicated region fallthrough
CT: control target
= control target key end

     0   :  { %8 = vsyncpa [#allocation3], 0  ;;  %s1395_s0 = inlined_call_operand.hbm [shape: f32[512,128], index: 0, kind: input, shape index: {}]   ;;  %s1396_s1 = inlined_call_operand.vmem [shape: f32[1,128], index: 1, kind: input, shape index: {}]   ;;  %s1397_s2 = inlined_call_operand.vmem [shape: f32[1,128], index: 2, kind: input, shape index: {}]   ;;  %s1398_s3 = inlined_call_operand.hbm [shape: f32[512,128], index: 3, kind: output, shape index: {}]  }
   0x1   :  { %10 = vsyncpa [#allocation3 + $0x1], 0 }
   0x2   :  { %11 = vsyncpa [#allocation4], 0 }
   0x3   :  { %13 = vsyncpa [#allocation4 + $0x1], 0  ;;  %s916_s12 = smov 0   ;;  %s918_s13 = smov 0  }
   0x4   :  { %s920_s14 = smov 0   ;;  %s922_s15 = smov 0  }
   0x5 LB: > { %s937_s16 = sadd.s32 4294967295, %s888_s15   ;;  %s660_s17 = sadd.s32 4294967294, %s888_s15   ;;  %s888_s15 = sphi %s922_s15, %s1410_s15   ;;  %s884_s14 = sphi %s920_s14, %s1409_s14   ;;  %s880_s13 = sphi %s918_s13, %s1408_s13   ;;  %s876_s12 = sphi %s916_s12, %s1407_s12  }
   0x6   : > { %s941_s18 = sadd.s32 1, %s888_s15   ;;  %s26_s19 = sadd.s32 1, %s884_s14 }
   0x7   : > { %s23_s20 = ssub.s32 %s888_s15, %s941_s18  ;;  %p33_p0 = scmp.ne.s32.totalorder %s884_s14, %s880_s13 }
   0x8   : > { %p24_p1 = scmp.eq.s32.totalorder %s23_s20, 0  ;;  %p34_p2 = scmp.eq.s32.totalorder %s888_s15, 0 }
   0x9   : > { %p39_p3 = scmp.ne.s32.totalorder %s880_s13, %s876_s12  ;;  %p40_p4 = scmp.eq.s32.totalorder %s937_s16, 0 }
   0xa   : > { %s953_s21 = scalar_select %p24_p1, %s884_s14, %s26_s19  }
   0xb   : > { %p955_p5 = por %p34_p2, %p33_p0  ;;  %p959_p6 = por %p40_p4, %p39_p3 }
   0xc   : > { %p105_p7 = scmp.eq.s32.totalorder %s937_s16, 3  ;;  %p111_p8 = scmp.eq.s32.totalorder %s660_s17, 3 }
   0xd   : > { %p690_p9 = scmp.lt.s32.totalorder %s888_s15, 4  ;;  %s137_s26 = sand.u32 1, %s884_s14  }
   0xe   : > { %p965_p10 = por %p105_p7, %p33_p0  ;;  %p969_p11 = por %p111_p8, %p39_p3 }
   0xf   : > { %s676_s27 = sshll.u32 %s888_s15, 11  ;;  %s663_s28 = sshll.u32 %s137_s26, 7 }
  0x10   : > { %s1402_s24 = scalar_select %p965_p10, 1, 0 }
  0x11   : > { %s1403_s25 = scalar_select %p969_p11, 1, 0 }
  0x12   : > { %s978_s4 = scalar_lea.hbm %s1395_s0, %s676_s27  ;;  %s141_s5 = scalar_lea.vmem [#allocation2], %s663_s28 }
  0x13   : > { %s148_s6 = sshll.u32 %s141_s5, 4  ;;  %p982_p12 = pnand %p690_p9, %p955_p5  ;;  %s986_s6 = int_to_ptr.vmem [resolvable:$true] %s148_s6 }
  0x14   : > { %s988_s8 = scalar_lea.sflag [#allocation3], %s137_s26  ;;  %s792_s9 = scalar_lea.hbm %s978_s4, 2048 }
  0x15   : > { %p793_p13 = scmp.ne.s32.totalorder %s978_s4, %s792_s9  ;;  %p794_p0 = pneg %p982_p12 }
  0x16   : > { %s797_s17 = scalar_lea.hbm %s1395_s0, 8192  ;;  %p798_p3 = scmp.lt.u32.totalorder %s978_s4, %s1395_s0 }
  0x17   : > { %p795_p1 = pnand %p794_p0, %p793_p13  ;;  %p799_p4 = scmp.lt.u32.totalorder %s797_s17, %s792_s9 }
  0x18   : > { %p801_p7 = scmp.lt.u32.totalorder %s792_s9, %s978_s4 }
  0x19   : > { %p796_p2 = pneg %p795_p1  ;;  %p800_p5 = por %p799_p4, %p798_p3 }
  0x1b   : > { %p802_p8 = por %p801_p7, %p800_p5 }
  0x1d   : > { %p803_p9 = pnand %p802_p8, %p796_p2 }
  0x1f   : > { %806 = shalt.err (!%p803_p9)
}
  0x20   : > { %s807_s22 = scalar_lea.vmem %s986_s6, 2048  ;;  %s890_s26 = smov [#allocation2]  }
  0x21   : > { %p808_p13 = scmp.ne.s32.totalorder %s986_s6, %s807_s22  ;;  %s812_s27 = sshll.u32 %s890_s26, 4  ;;  %s813_s27 = int_to_ptr.vmem [resolvable:$false] %s812_s27 }
  0x22   : > { %s814_s28 = scalar_lea.vmem %s813_s27, 4096  ;;  %p815_p10 = scmp.lt.s32.totalorder %s986_s6, %s813_s27 }
  0x23   : > { %p810_p1 = pnand %p808_p13, %p794_p0  ;;  %p816_p3 = scmp.lt.s32.totalorder %s814_s28, %s807_s22 }
  0x25   : > { %p811_p11 = pneg %p810_p1  ;;  %p817_p4 = por %p816_p3, %p815_p10 }
  0x27   : > { %p818_p5 = pnand %p817_p4, %p811_p11 }
  0x29   : > { %821 = shalt.err (!%p818_p5)
}
  0x2a   : > { %s891_s29 = smov 128   ;;  %s892_s30 = smov 8  }
  0x2b   : > { %685 = dma.hbm_to_vmem [thread:$0]  (!%p982_p12), %s978_s4, 2048, %s986_s6, %s988_s8, %s891_s29, %s891_s29, %s892_s30  }
  0x2c   : > { %p666_p0 = scmp.ge.s32.totalorder %s888_s15, 1  ;;  %p156_p2 = scmp.lt.s32.totalorder %s888_s15, 5 }
  0x2e   : > { %p157_p7 = pnand %p666_p0, %p156_p2 }
  0x2f   : > { %s1019_s5 = sand.u32 (!%p157_p7), 1, %s880_s13  }
  0x30   : > { %160 = sbr.rel (%p157_p7) target bundleno = 440 (0x1b8), region = 32  ;;  %s667_s9 = sshll.u32 (!%p157_p7), %s1019_s5, 7 }
  0x31   : > { %s163_s10 = scalar_lea.sflag (!%p157_p7), [#allocation3], %s1019_s5  ;;  %s1025_s11 = scalar_lea.vmem (!%p157_p7), [#allocation2], %s667_s9 }
  0x37   : > { %867 = dma.done.wait (%p959_p6), %s163_s10, 2048  }
  0x38   : > { %869 = vsyncadd (%p959_p6), %s163_s10, 4294965248  ;;  %v191_v0 = vld [vmem:[%s1025_s11] sm:$0xff]  ;;  %v193_v1 = vld [vmem:[%s1025_s11 + $0x10] sm:$0xff]  ;;  %s1232_s8 = scalar_lea.vmem [#allocation5], %s667_s9  ;;  %s677_s17 = sshll.u32 %s937_s16, 11 }
  0x39   : > { %209 = vadd.xlane.f32.xlu0 %v191_v0  ;;  %213 = vadd.xlane.f32.xlu1 %v193_v1  ;;  %v192_v2 = vld [vmem:[%s1025_s11 + $0x8] sm:$0xff]  ;;  %v194_v3 = vld [vmem:[%s1025_s11 + $0x18] sm:$0xff]  ;;  %v195_v4 = vld [vmem:[%s1025_s11 + $0x20] sm:$0xff]  ;;  %s587_s19 = sshll.u32 %s1232_s8, 4  ;;  %s1347_s26 = scalar_lea.hbm %s1398_s3, %s677_s17  ;;  %s1349_s19 = int_to_ptr.vmem [resolvable:$true] %s587_s19 }
  0x3a   : > { %v196_v5 = vld [vmem:[%s1025_s11 + $0x28] sm:$0xff]  ;;  %v197_v6 = vld [vmem:[%s1025_s11 + $0x30] sm:$0xff]  ;;  %v198_v7 = vld [vmem:[%s1025_s11 + $0x38] sm:$0xff]  ;;  %s574_s16 = scalar_lea.sflag [#allocation4], %s1019_s5  ;;  %s822_s27 = scalar_lea.vmem %s1349_s19, 2048 }
  0x3b   : > { %v199_v8 = vld [vmem:[%s1025_s11 + $0x40] sm:$0xff]  ;;  %v200_v9 = vld [vmem:[%s1025_s11 + $0x48] sm:$0xff]  ;;  %v201_v10 = vld [vmem:[%s1025_s11 + $0x50] sm:$0xff]  ;;  %p823_p6 = scmp.ne.s32.totalorder %s1349_s19, %s822_s27  ;;  %p1405_p10 = scmp.ne.s32.totalorder %s1402_s24, 0 }
  0x3c   : > { %v1043_v11 = vld [vmem:[%s1025_s11 + $0x58] sm:$0xff]  ;;  %v1047_v12 = vld [vmem:[%s1025_s11 + $0x60] sm:$0xff]  ;;  %v1050_v13 = vld [vmem:[%s1025_s11 + $0x68] sm:$0xff]  ;;  %s893_s28 = smov [#allocation5]  }
  0x3d   : > { %211 = vadd.xlane.f32.xlu0 %v192_v2  ;;  %215 = vadd.xlane.f32.xlu1 %v194_v3  ;;  %v1055_v14 = vld [vmem:[%s1025_s11 + $0x70] sm:$0xff]  ;;  %v1058_v15 = vld [vmem:[%s1025_s11 + $0x78] sm:$0xff]  ;;  %p824_p11 = pnand %p823_p6, %p1405_p10  ;;  %s826_s29 = sshll.u32 %s893_s28, 4  ;;  %s827_s29 = int_to_ptr.vmem [resolvable:$false] %s826_s29 }
  0x3e   : > { %s828_s30 = scalar_lea.vmem %s827_s29, 4096  ;;  %p829_p8 = scmp.lt.s32.totalorder %s1349_s19, %s827_s29 }
  0x3f   : > { %p825_p12 = pneg %p824_p11  ;;  %p830_p9 = scmp.lt.s32.totalorder %s828_s30, %s822_s27 }
  0x41   : > { %217 = vadd.xlane.f32.xlu0 %v195_v4  ;;  %219 = vadd.xlane.f32.xlu1 %v196_v5  ;;  %p831_p13 = por %p830_p9, %p829_p8 }
  0x43   : > { %p832_p1 = pnand %p831_p13, %p825_p12 }
  0x45   : > { %221 = vadd.xlane.f32.xlu0 %v197_v6  ;;  %223 = vadd.xlane.f32.xlu1 %v198_v7 }
  0x49   : > { %225 = vadd.xlane.f32.xlu0 %v199_v8  ;;  %227 = vadd.xlane.f32.xlu1 %v200_v9 }
  0x4d   : > { %229 = vadd.xlane.f32.xlu0 %v201_v10  ;;  %231 = vadd.xlane.f32.xlu1 %v1043_v11 }
  0x51   : > { %233 = vadd.xlane.f32.xlu0 %v1047_v12  ;;  %235 = vadd.xlane.f32.xlu1 %v1050_v13 }
  0x55   : > { %237 = vadd.xlane.f32.xlu0 %v1055_v14  ;;  %239 = vadd.xlane.f32.xlu1 %v1058_v15 }
  0xc6   : > { %v210_v16 = vpop.xlane.xlu0 %209  ;;  %v214_v17 = vpop.xlane.xlu1 %213 }
  0xc7   : > { %v241_v18 = vmul.f32 0.0078125, %v210_v16  ;;  %v243_v19 = vmul.f32 0.0078125, %v214_v17 }
  0xc9   : > { %v1062_v20 = vsub.f32 %v191_v0, %v241_v18  ;;  %v1064_v21 = vsub.f32 %v193_v1, %v243_v19 }
  0xca   : > { %v212_v22 = vpop.xlane.xlu0 %211  ;;  %v216_v23 = vpop.xlane.xlu1 %215 }
  0xcb   : > { %v242_v24 = vmul.f32 0.0078125, %v212_v22  ;;  %v273_v25 = vmul.f32 %v1062_v20, %v1062_v20  ;;  %v244_v26 = vmul.f32 0.0078125, %v216_v23  ;;  %v275_v29 = vmul.f32 %v1064_v21, %v1064_v21 }
  0xcd   : > { %v1068_v27 = vsub.f32 %v192_v2, %v242_v24  ;;  %289 = vadd.xlane.f32.xlu0 %v273_v25  ;;  %v1070_v28 = vsub.f32 %v194_v3, %v244_v26 }
  0xce   : > { %v218_v30 = vpop.xlane.xlu0 %217  ;;  %v220_v31 = vpop.xlane.xlu1 %219 }
  0xcf   : > { %v245_v32 = vmul.f32 0.0078125, %v218_v30  ;;  %v274_v33 = vmul.f32 %v1068_v27, %v1068_v27  ;;  %v246_v34 = vmul.f32 0.0078125, %v220_v31  ;;  %v276_v37 = vmul.f32 %v1070_v28, %v1070_v28 }
  0xd1   : > { %v1076_v35 = vsub.f32 %v195_v4, %v245_v32  ;;  %293 = vadd.xlane.f32.xlu0 %v275_v29  ;;  %291 = vadd.xlane.f32.xlu1 %v274_v33  ;;  %v1078_v36 = vsub.f32 %v196_v5, %v246_v34 }
  0xd2   : > { %v222_v38 = vpop.xlane.xlu0 %221  ;;  %v224_v39 = vpop.xlane.xlu1 %223 }
  0xd3   : > { %v247_v40 = vmul.f32 0.0078125, %v222_v38  ;;  %v277_v41 = vmul.f32 %v1076_v35, %v1076_v35  ;;  %v248_v42 = vmul.f32 0.0078125, %v224_v39  ;;  %v278_v45 = vmul.f32 %v1078_v36, %v1078_v36 }
  0xd5   : > { %v1084_v43 = vsub.f32 %v197_v6, %v247_v40  ;;  %295 = vadd.xlane.f32.xlu1 %v276_v37  ;;  %297 = vadd.xlane.f32.xlu0 %v277_v41  ;;  %v1086_v44 = vsub.f32 %v198_v7, %v248_v42 }
  0xd6   : > { %v226_v46 = vpop.xlane.xlu0 %225  ;;  %v228_v47 = vpop.xlane.xlu1 %227 }
  0xd7   : > { %v249_v48 = vmul.f32 0.0078125, %v226_v46  ;;  %v279_v49 = vmul.f32 %v1084_v43, %v1084_v43  ;;  %v250_v50 = vmul.f32 0.0078125, %v228_v47  ;;  %v280_v53 = vmul.f32 %v1086_v44, %v1086_v44 }
  0xd9   : > { %v1092_v51 = vsub.f32 %v199_v8, %v249_v48  ;;  %299 = vadd.xlane.f32.xlu1 %v278_v45  ;;  %301 = vadd.xlane.f32.xlu0 %v279_v49  ;;  %v1094_v52 = vsub.f32 %v200_v9, %v250_v50 }
  0xda   : > { %v230_v54 = vpop.xlane.xlu0 %229  ;;  %v232_v55 = vpop.xlane.xlu1 %231 }
  0xdb   : > { %v251_v56 = vmul.f32 0.0078125, %v230_v54  ;;  %v281_v57 = vmul.f32 %v1092_v51, %v1092_v51  ;;  %v252_v58 = vmul.f32 0.0078125, %v232_v55  ;;  %v282_v61 = vmul.f32 %v1094_v52, %v1094_v52 }
  0xdd   : > { %v1100_v59 = vsub.f32 %v201_v10, %v251_v56  ;;  %303 = vadd.xlane.f32.xlu1 %v280_v53  ;;  %305 = vadd.xlane.f32.xlu0 %v281_v57  ;;  %v1103_v60 = vsub.f32 %v1043_v11, %v252_v58 }
  0xde   : > { %v234_v62 = vpop.xlane.xlu0 %233  ;;  %v236_v63 = vpop.xlane.xlu1 %235 }
  0xdf   : > { %v253_v0 = vmul.f32 0.0078125, %v234_v62  ;;  %v283_v1 = vmul.f32 %v1100_v59, %v1100_v59  ;;  %v254_v2 = vmul.f32 0.0078125, %v236_v63  ;;  %v284_v5 = vmul.f32 %v1103_v60, %v1103_v60 }
  0xe1   : > { %v1110_v3 = vsub.f32 %v1047_v12, %v253_v0  ;;  %307 = vadd.xlane.f32.xlu1 %v282_v61  ;;  %309 = vadd.xlane.f32.xlu0 %v283_v1  ;;  %v1113_v4 = vsub.f32 %v1050_v13, %v254_v2 }
  0xe2   : > { %v238_v6 = vpop.xlane.xlu0 %237  ;;  %v240_v7 = vpop.xlane.xlu1 %239 }
  0xe3   : > { %v255_v8 = vmul.f32 0.0078125, %v238_v6  ;;  %v285_v9 = vmul.f32 %v1110_v3, %v1110_v3  ;;  %v256_v10 = vmul.f32 0.0078125, %v240_v7  ;;  %v286_v13 = vmul.f32 %v1113_v4, %v1113_v4 }
  0xe5   : > { %v1120_v11 = vsub.f32 %v1055_v14, %v255_v8  ;;  %311 = vadd.xlane.f32.xlu1 %v284_v5  ;;  %313 = vadd.xlane.f32.xlu0 %v285_v9  ;;  %v1123_v12 = vsub.f32 %v1058_v15, %v256_v10 }
  0xe7   : > { %v287_v16 = vmul.f32 %v1120_v11, %v1120_v11  ;;  %v288_v17 = vmul.f32 %v1123_v12, %v1123_v12 }
  0xe9   : > { %315 = vadd.xlane.f32.xlu1 %v286_v13  ;;  %317 = vadd.xlane.f32.xlu0 %v287_v16 }
  0xed   : > { %319 = vadd.xlane.f32.xlu1 %v288_v17 }
 0x15a   : > { %v290_v18 = vpop.xlane.xlu0 %289 }
 0x15b   : > { %v321_v14 = vmul.f32 0.007874016, %v290_v18 }
 0x15d   : > { %728 = vrsqrt.f32 %v321_v14  ;;  %vm339_vm0 = vcmp.eq.f32.partialorder %v321_v14, inf  ;;  %vm341_vm1 = vcmp.eq.f32.partialorder %v321_v14, 0.0  ;;  %v342_v38 = vand.u32 2147483648, %v321_v14 }
 0x15e   : > { %v292_v19 = vpop.xlane.xlu1 %291  ;;  %v294_v22 = vpop.xlane.xlu0 %293 }
 0x15f   : > { %v322_v23 = vmul.f32 0.007874016, %v292_v19  ;;  %v323_v15 = vmul.f32 0.007874016, %v294_v22 }
 0x161   : > { %730 = vrsqrt.f32 %v322_v23  ;;  %vm346_vm2 = vcmp.eq.f32.partialorder %v322_v23, inf  ;;  %vm348_vm3 = vcmp.eq.f32.partialorder %v322_v23, 0.0  ;;  %v349_v40 = vand.u32 2147483648, %v322_v23 }
 0x162   : > { %732 = vrsqrt.f32 %v323_v15  ;;  %v296_v24 = vpop.xlane.xlu1 %295  ;;  %v298_v25 = vpop.xlane.xlu0 %297  ;;  %vm353_vm4 = vcmp.eq.f32.partialorder %v323_v15, inf  ;;  %vm355_vm5 = vcmp.eq.f32.partialorder %v323_v15, 0.0  ;;  %v356_v54 = vand.u32 2147483648, %v323_v15 }
 0x163   : > { %v1131_v26 = vmul.f32 0.007874016, %v296_v24  ;;  %v1133_v29 = vmul.f32 0.007874016, %v298_v25 }
 0x165   : > { %734 = vrsqrt.f32 %v1131_v26  ;;  %vm360_vm6 = vcmp.eq.f32.partialorder %v1131_v26, inf  ;;  %vm362_vm7 = vcmp.eq.f32.partialorder %v1131_v26, 0.0  ;;  %v363_v56 = vand.u32 2147483648, %v1131_v26 }
 0x166   : > { %736 = vrsqrt.f32 %v1133_v29  ;;  %v300_v30 = vpop.xlane.xlu1 %299  ;;  %v302_v31 = vpop.xlane.xlu0 %301  ;;  %vm367_vm8 = vcmp.eq.f32.partialorder %v1133_v29, inf  ;;  %vm369_vm9 = vcmp.eq.f32.partialorder %v1133_v29, 0.0  ;;  %v370_v0 = vand.u32 2147483648, %v1133_v29 }
 0x167   : > { %v729_v32 = vpop.eup %728  ;;  %v1137_v33 = vmul.f32 0.007874016, %v300_v30  ;;  %v1139_v34 = vmul.f32 0.007874016, %v302_v31 }
 0x168   : > { %v338_v37 = vmul.f32 %v729_v32, %v321_v14  ;;  %v1187_v32 = vld [vmem:[%s1396_s1] ss:$0 sm:$0xff] }
 0x169   : > { %738 = vrsqrt.f32 %v1137_v33  ;;  %vm374_vm10 = vcmp.eq.f32.partialorder %v1137_v33, inf  ;;  %vm376_vm11 = vcmp.eq.f32.partialorder %v1137_v33, 0.0  ;;  %v377_v16 = vand.u32 2147483648, %v1137_v33 }
 0x16a   : > { %v340_v39 = vsel %vm339_vm0, %v321_v14, %v338_v37  ;;  %740 = vrsqrt.f32 %v1139_v34  ;;  %v304_v41 = vpop.xlane.xlu1 %303  ;;  %v306_v42 = vpop.xlane.xlu0 %305  ;;  %vm381_vm12 = vcmp.eq.f32.partialorder %v1139_v34, inf  ;;  %vm383_vm13 = vcmp.eq.f32.partialorder %v1139_v34, 0.0 }
 0x16b   : > { %v731_v45 = vpop.eup %730  ;;  %v343_v46 = vsel %vm341_vm1, %v342_v38, %v340_v39  ;;  %v1143_v47 = vmul.f32 0.007874016, %v304_v41  ;;  %v1145_v48 = vmul.f32 0.007874016, %v306_v42  ;;  %v384_v31 = vand.u32 2147483648, %v1139_v34 }
 0x16c   : > { %v733_v49 = vpop.eup %732  ;;  %v449_v50 = vadd.f32 1e-05, %v343_v46  ;;  %v345_v53 = vmul.f32 %v731_v45, %v322_v23 }
 0x16d   : > { %v352_v55 = vmul.f32 %v733_v49, %v323_v15  ;;  %742 = vrsqrt.f32 %v1143_v47  ;;  %vm388_vm14 = vcmp.eq.f32.partialorder %v1143_v47, inf  ;;  %vm390_vm15 = vcmp.eq.f32.partialorder %v1143_v47, 0.0 }
 0x16e   : > { %744 = vrcp.f32 %v449_v50  ;;  %v347_v57 = vsel %vm346_vm2, %v322_v23, %v345_v53  ;;  %v308_v58 = vpop.xlane.xlu1 %307  ;;  %v310_v7 = vpop.xlane.xlu0 %309  ;;  %vm395_vm0 = vcmp.eq.f32.partialorder %v1145_v48, inf  ;;  %vm397_vm1 = vcmp.eq.f32.partialorder %v1145_v48, 0.0 }
 0x16f   : > { %v735_v61 = vpop.eup %734  ;;  %v350_v62 = vsel %vm348_vm3, %v349_v40, %v347_v57  ;;  %v354_v63 = vsel %vm353_vm4, %v323_v15, %v352_v55  ;;  %746 = vrsqrt.f32 %v1145_v48  ;;  %v1163_v10 = vmul.f32 0.007874016, %v308_v58 }
 0x170   : > { %v737_v1 = vpop.eup %736  ;;  %v450_v2 = vadd.f32 1e-05, %v350_v62  ;;  %v357_v5 = vsel %vm355_vm5, %v356_v54, %v354_v63  ;;  %v359_v6 = vmul.f32 %v735_v61, %v1131_v26  ;;  %v1175_v19 = vmul.f32 0.007874016, %v310_v7 }
 0x171   : > { %v451_v8 = vadd.f32 1e-05, %v357_v5  ;;  %v366_v9 = vmul.f32 %v737_v1, %v1133_v29  ;;  %v391_v40 = vand.u32 2147483648, %v1143_v47  ;;  %v398_v57 = vand.u32 2147483648, %v1145_v48 }
 0x172   : > { %748 = vrcp.f32 %v450_v2  ;;  %v361_v13 = vsel %vm360_vm6, %v1131_v26, %v359_v6  ;;  %v312_v25 = vpop.xlane.xlu1 %311  ;;  %v314_v49 = vpop.xlane.xlu0 %313  ;;  %vm402_vm2 = vcmp.eq.f32.partialorder %v1163_v10, inf  ;;  %vm404_vm3 = vcmp.eq.f32.partialorder %v1163_v10, 0.0 }
 0x173   : > { %v739_v17 = vpop.eup %738  ;;  %750 = vrcp.f32 %v451_v8  ;;  %v364_v18 = vsel %vm362_vm7, %v363_v56, %v361_v13  ;;  %v368_v14 = vsel %vm367_vm8, %v1133_v29, %v366_v9  ;;  %v1219_v63 = vmul.f32 0.007874016, %v314_v49 }
 0x174   : > { %v741_v22 = vpop.eup %740  ;;  %v452_v23 = vadd.f32 1e-05, %v364_v18  ;;  %v371_v15 = vsel %vm369_vm9, %v370_v0, %v368_v14  ;;  %v373_v24 = vmul.f32 %v739_v17, %v1137_v33  ;;  %752 = vrsqrt.f32 %v1163_v10 }
 0x175   : > { %v453_v30 = vadd.f32 1e-05, %v371_v15  ;;  %v380_v26 = vmul.f32 %v741_v22, %v1139_v34  ;;  %v405_v14 = vand.u32 2147483648, %v1163_v10  ;;  %vm409_vm4 = vcmp.eq.f32.partialorder %v1175_v19, inf }
 0x176   : > { %754 = vrcp.f32 %v452_v23  ;;  %v375_v29 = vsel %vm374_vm10, %v1137_v33, %v373_v24  ;;  %v1204_v33 = vmul.f32 0.007874016, %v312_v25  ;;  %v316_v58 = vpop.xlane.xlu1 %315  ;;  %v318_v24 = vpop.xlane.xlu0 %317  ;;  %vm411_vm5 = vcmp.eq.f32.partialorder %v1175_v19, 0.0 }
 0x177   : > { %v743_v37 = vpop.eup %742  ;;  %756 = vrcp.f32 %v453_v30  ;;  %v378_v38 = vsel %vm376_vm11, %v377_v16, %v375_v29  ;;  %v382_v39 = vsel %vm381_vm12, %v1139_v34, %v380_v26  ;;  %v1209_v34 = vld [vmem:[%s1397_s2] ss:$0 sm:$0xff]  ;;  %v1226_v8 = vmul.f32 0.007874016, %v316_v58 }
 0x178   : > { %v745_v41 = vpop.eup %744  ;;  %v454_v42 = vadd.f32 1e-05, %v378_v38  ;;  %v385_v45 = vsel %vm383_vm13, %v384_v31, %v382_v39  ;;  %v387_v46 = vmul.f32 %v743_v37, %v1143_v47  ;;  %758 = vrsqrt.f32 %v1175_v19 }
 0x179   : > { %v747_v50 = vpop.eup %746  ;;  %v503_v53 = vmul.f32 %v745_v41, %v1187_v32  ;;  %v455_v54 = vadd.f32 1e-05, %v385_v45  ;;  %v412_v39 = vand.u32 2147483648, %v1175_v19  ;;  %vm416_vm6 = vcmp.eq.f32.partialorder %v1204_v33, inf }
 0x17a   : > { %760 = vrcp.f32 %v454_v42  ;;  %v389_v55 = vsel %vm388_vm14, %v1143_v47, %v387_v46  ;;  %v394_v56 = vmul.f32 %v747_v50, %v1145_v48  ;;  %v320_v25 = vpop.xlane.xlu1 %319  ;;  %v1258_v42 = vmul.f32 0.007874016, %v318_v24 }
 0x17b   : > { %v519_v61 = vmul.f32 %v503_v53, %v1062_v20  ;;  %762 = vrcp.f32 %v455_v54  ;;  %v392_v62 = vsel %vm390_vm15, %v391_v40, %v389_v55  ;;  %vm418_vm7 = vcmp.eq.f32.partialorder %v1204_v33, 0.0 }
 0x17c   : > { %v749_v0 = vpop.eup %748  ;;  %v456_v1 = vadd.f32 1e-05, %v392_v62  ;;  %v396_v2 = vsel %vm395_vm0, %v1145_v48, %v394_v56  ;;  %764 = vrsqrt.f32 %v1204_v33  ;;  %v419_v62 = vand.u32 2147483648, %v1204_v33 }
 0x17d   : > { %v751_v5 = vpop.eup %750  ;;  %v541_v6 = vadd.f32 %v1209_v34, %v519_v61  ;;  %v504_v20 = vmul.f32 %v749_v0, %v1187_v32  ;;  %v399_v7 = vsel %vm397_vm1, %v398_v57, %v396_v2  ;;  %vm423_vm8 = vcmp.eq.f32.partialorder %v1219_v63, inf }
 0x17e   : > { %v753_v47 = vpop.eup %752  ;;  %v505_v9 = vmul.f32 %v751_v5, %v1187_v32  ;;  %766 = vrcp.f32 %v456_v1  ;;  %v457_v13 = vadd.f32 1e-05, %v399_v7  ;;  %vm425_vm9 = vcmp.eq.f32.partialorder %v1219_v63, 0.0 }
 0x17f   : > { %557 = vst [vmem:[%s1232_s8] sm:$0xff] %v541_v6  ;;  %v520_v48 = vmul.f32 %v504_v20, %v1068_v27  ;;  %v401_v16 = vmul.f32 %v753_v47, %v1163_v10  ;;  %768 = vrsqrt.f32 %v1219_v63  ;;  %vm430_vm10 = vcmp.eq.f32.partialorder %v1226_v8, inf }
 0x180   : > { %v755_v17 = vpop.eup %754  ;;  %v521_v18 = vmul.f32 %v505_v9, %v1064_v21  ;;  %770 = vrcp.f32 %v457_v13  ;;  %v426_v13 = vand.u32 2147483648, %v1219_v63  ;;  %vm432_vm11 = vcmp.eq.f32.partialorder %v1226_v8, 0.0 }
 0x181   : > { %v757_v22 = vpop.eup %756  ;;  %v542_v23 = vadd.f32 %v1209_v34, %v520_v48  ;;  %v506_v27 = vmul.f32 %v755_v17, %v1187_v32  ;;  %v403_v15 = vsel %vm402_vm2, %v1163_v10, %v401_v16  ;;  %772 = vrsqrt.f32 %v1226_v8 }
 0x182   : > { %v759_v30 = vpop.eup %758  ;;  %v543_v21 = vadd.f32 %v1209_v34, %v521_v18  ;;  %v507_v26 = vmul.f32 %v757_v22, %v1187_v32  ;;  %v406_v31 = vsel %vm404_vm3, %v405_v14, %v403_v15  ;;  %v1260_v10 = vmul.f32 0.007874016, %v320_v25 }
 0x183   : > { %558 = vst [vmem:[%s1232_s8 + $0x8] sm:$0xff] %v542_v23  ;;  %v522_v29 = vmul.f32 %v506_v27, %v1070_v28  ;;  %v458_v37 = vadd.f32 1e-05, %v406_v31  ;;  %v408_v38 = vmul.f32 %v759_v30, %v1175_v19  ;;  %v433_v16 = vand.u32 2147483648, %v1226_v8 }
 0x184   : > { %v761_v40 = vpop.eup %760  ;;  %559 = vst [vmem:[%s1232_s8 + $0x10] sm:$0xff] %v543_v21  ;;  %v523_v41 = vmul.f32 %v507_v26, %v1076_v35  ;;  %vm437_vm12 = vcmp.eq.f32.partialorder %v1258_v42, inf  ;;  %vm439_vm13 = vcmp.eq.f32.partialorder %v1258_v42, 0.0  ;;  %vm444_vm14 = vcmp.eq.f32.partialorder %v1260_v10, inf }
 0x185   : > { %v763_v45 = vpop.eup %762  ;;  %v544_v28 = vadd.f32 %v1209_v34, %v522_v29  ;;  %v508_v46 = vmul.f32 %v761_v40, %v1187_v32  ;;  %774 = vrcp.f32 %v458_v37  ;;  %v410_v49 = vsel %vm409_vm4, %v1175_v19, %v408_v38 }
 0x186   : > { %v765_v50 = vpop.eup %764  ;;  %v545_v35 = vadd.f32 %v1209_v34, %v523_v41  ;;  %v509_v53 = vmul.f32 %v763_v45, %v1187_v32  ;;  %v413_v54 = vsel %vm411_vm5, %v412_v39, %v410_v49  ;;  %776 = vrsqrt.f32 %v1258_v42 }
 0x187   : > { %560 = vst [vmem:[%s1232_s8 + $0x18] sm:$0xff] %v544_v28  ;;  %v524_v55 = vmul.f32 %v508_v46, %v1078_v36  ;;  %v459_v56 = vadd.f32 1e-05, %v413_v54  ;;  %v415_v57 = vmul.f32 %v765_v50, %v1204_v33  ;;  %778 = vrsqrt.f32 %v1260_v10 }
 0x188   : > { %v767_v58 = vpop.eup %766  ;;  %561 = vst [vmem:[%s1232_s8 + $0x20] sm:$0xff] %v545_v35  ;;  %v525_v61 = vmul.f32 %v509_v53, %v1084_v43  ;;  %v447_v39 = vand.u32 2147483648, %v1260_v10  ;;  %vm446_vm15 = vcmp.eq.f32.partialorder %v1260_v10, 0.0 }
 0x189   : > { %v769_v19 = vpop.eup %768  ;;  %v546_v36 = vadd.f32 %v1209_v34, %v524_v55  ;;  %v510_v0 = vmul.f32 %v767_v58, %v1187_v32  ;;  %780 = vrcp.f32 %v459_v56  ;;  %v417_v1 = vsel %vm416_vm6, %v1204_v33, %v415_v57 }
 0x18a   : > { %v771_v2 = vpop.eup %770  ;;  %v547_v43 = vadd.f32 %v1209_v34, %v525_v61  ;;  %v420_v5 = vsel %vm418_vm7, %v419_v62, %v417_v1  ;;  %v422_v6 = vmul.f32 %v769_v19, %v1219_v63 }
 0x18b   : > { %v773_v20 = vpop.eup %772  ;;  %562 = vst [vmem:[%s1232_s8 + $0x28] sm:$0xff] %v546_v36  ;;  %v526_v7 = vmul.f32 %v510_v0, %v1086_v44  ;;  %v511_v47 = vmul.f32 %v771_v2, %v1187_v32  ;;  %v460_v9 = vadd.f32 1e-05, %v420_v5 }
 0x18c   : > { %563 = vst [vmem:[%s1232_s8 + $0x30] sm:$0xff] %v547_v43  ;;  %v424_v33 = vsel %vm423_vm8, %v1219_v63, %v422_v6  ;;  %v429_v48 = vmul.f32 %v773_v20, %v1226_v8 }
 0x18d   : > { %v548_v44 = vadd.f32 %v1209_v34, %v526_v7  ;;  %v527_v17 = vmul.f32 %v511_v47, %v1092_v51  ;;  %782 = vrcp.f32 %v460_v9  ;;  %v427_v18 = vsel %vm425_vm9, %v426_v13, %v424_v33 }
 0x18e   : > { %v461_v14 = vadd.f32 1e-05, %v427_v18  ;;  %v431_v22 = vsel %vm430_vm10, %v1226_v8, %v429_v48  ;;  %v440_v8 = vand.u32 2147483648, %v1258_v42 }
 0x18f   : > { %v775_v23 = vpop.eup %774  ;;  %564 = vst [vmem:[%s1232_s8 + $0x38] sm:$0xff] %v548_v44  ;;  %v549_v63 = vadd.f32 %v1209_v34, %v527_v17  ;;  %v434_v27 = vsel %vm432_vm11, %v433_v16, %v431_v22 }
 0x190   : > { %v777_v15 = vpop.eup %776  ;;  %v512_v24 = vmul.f32 %v775_v23, %v1187_v32  ;;  %784 = vrcp.f32 %v461_v14  ;;  %v462_v25 = vadd.f32 1e-05, %v434_v27 }
 0x191   : > { %565 = vst [vmem:[%s1232_s8 + $0x40] sm:$0xff] %v549_v63  ;;  %v436_v51 = vmul.f32 %v777_v15, %v1258_v42  ;;  %v779_v30 = vpop.eup %778 }
 0x192   : > { %v528_v21 = vmul.f32 %v512_v24, %v1094_v52  ;;  %786 = vrcp.f32 %v462_v25  ;;  %v443_v29 = vmul.f32 %v779_v30, %v1260_v10 }
 0x193   : > { %v781_v26 = vpop.eup %780  ;;  %v438_v31 = vsel %vm437_vm12, %v1258_v42, %v436_v51 }
 0x194   : > { %v550_v37 = vadd.f32 %v1209_v34, %v528_v21  ;;  %v513_v38 = vmul.f32 %v781_v26, %v1187_v32  ;;  %v441_v52 = vsel %vm439_vm13, %v440_v8, %v438_v31  ;;  %v445_v41 = vsel %vm444_vm14, %v1260_v10, %v443_v29 }
 0x195   : > { %v463_v40 = vadd.f32 1e-05, %v441_v52  ;;  %v448_v45 = vsel %vm446_vm15, %v447_v39, %v445_v41 }
 0x196   : > { %566 = vst [vmem:[%s1232_s8 + $0x48] sm:$0xff] %v550_v37  ;;  %v529_v42 = vmul.f32 %v513_v38, %v1100_v59  ;;  %v464_v46 = vadd.f32 1e-05, %v448_v45 }
 0x197   : > { %v783_v28 = vpop.eup %782  ;;  %788 = vrcp.f32 %v463_v40 }
 0x198   : > { %v551_v49 = vadd.f32 %v1209_v34, %v529_v42  ;;  %v514_v50 = vmul.f32 %v783_v28, %v1187_v32  ;;  %790 = vrcp.f32 %v464_v46 }
 0x19a   : > { %v785_v35 = vpop.eup %784  ;;  %567 = vst [vmem:[%s1232_s8 + $0x50] sm:$0xff] %v551_v49  ;;  %v530_v53 = vmul.f32 %v514_v50, %v1103_v60 }
 0x19b   : > { %v515_v10 = vmul.f32 %v785_v35, %v1187_v32 }
 0x19c   : > { %v787_v59 = vpop.eup %786  ;;  %v552_v54 = vadd.f32 %v1209_v34, %v530_v53 }
 0x19d   : > { %v531_v55 = vmul.f32 %v515_v10, %v1110_v3  ;;  %v516_v56 = vmul.f32 %v787_v59, %v1187_v32 }
 0x19e   : > { %568 = vst [vmem:[%s1232_s8 + $0x58] sm:$0xff] %v552_v54 }
 0x19f   : > { %v553_v57 = vadd.f32 %v1209_v34, %v531_v55  ;;  %v532_v58 = vmul.f32 %v516_v56, %v1113_v4 }
 0x1a1   : > { %v789_v61 = vpop.eup %788  ;;  %569 = vst [vmem:[%s1232_s8 + $0x60] sm:$0xff] %v553_v57  ;;  %v554_v60 = vadd.f32 %v1209_v34, %v532_v58 }
 0x1a2   : > { %v517_v62 = vmul.f32 %v789_v61, %v1187_v32  ;;  %v791_v19 = vpop.eup %790 }
 0x1a3   : > { %570 = vst [vmem:[%s1232_s8 + $0x68] sm:$0xff] %v554_v60  ;;  %v518_v36 = vmul.f32 %v791_v19, %v1187_v32 }
 0x1a4   : > { %v533_v3 = vmul.f32 %v517_v62, %v1120_v11 }
 0x1a5   : > { %v534_v4 = vmul.f32 %v518_v36, %v1123_v12 }
 0x1a6   : > { %v555_v0 = vadd.f32 %v1209_v34, %v533_v3 }
 0x1a7   : > { %v556_v11 = vadd.f32 %v1209_v34, %v534_v4 }
 0x1a8   : > { %571 = vst [vmem:[%s1232_s8 + $0x70] sm:$0xff] %v555_v0 }
 0x1a9   : > { %572 = vst [vmem:[%s1232_s8 + $0x78] sm:$0xff] %v556_v11 }
 0x1aa   : > { %835 = shalt.err (!%p832_p1)
}
 0x1ab   : > { %s836_s9 = scalar_lea.hbm %s1347_s26, 2048  ;;  %s840_s23 = scalar_lea.hbm %s1398_s3, 8192 }
 0x1ac   : > { %p837_p3 = scmp.ne.s32.totalorder %s1347_s26, %s836_s9  ;;  %p841_p0 = scmp.lt.u32.totalorder %s1347_s26, %s1398_s3 }
 0x1ad   : > { %p842_p2 = scmp.lt.u32.totalorder %s840_s23, %s836_s9  ;;  %p844_p6 = scmp.lt.u32.totalorder %s836_s9, %s1347_s26 }
 0x1ae   : > { %p838_p4 = pnand %p837_p3, %p1405_p10 }
 0x1af   : > { %p843_p7 = por %p842_p2, %p841_p0 }
 0x1b0   : > { %p839_p5 = pneg %p838_p4 }
 0x1b1   : > { %p845_p11 = por %p844_p6, %p843_p7 }
 0x1b3   : > { %p846_p12 = pnand %p845_p11, %p839_p5 }
 0x1b5   : > { %849 = shalt.err (!%p846_p12)
}
 0x1b6   : > { %s894_s7 = smov 128   ;;  %s895_s8 = smov 8  }
 0x1b7   : > { %680 = dma.vmem_to_hbm [thread:$0]  (%p1405_p10), %s1349_s19, 2048, %s1347_s26, %s574_s16, %s894_s7, %s894_s7, %s895_s8  }
 0x1b8 PF: > { %p691_p8 = scmp.ge.s32.totalorder %s888_s15, 2  ;;  %s602_s17 = sand.u32 1, %s876_s12  }
 0x1b9   : > { %p1406_p9 = scmp.ne.s32.totalorder %s1403_s25, 0  ;;  %s603_s20 = scalar_lea.sflag [#allocation4], %s602_s17 }
 0x1bb   : > { %p687_p13 = pnand %p691_p8, %p1406_p9 }
 0x1bd   : > { %871 = dma.done.wait (!%p687_p13), %s603_s20, 2048  }
 0x1be   : > { %873 = vsyncadd (!%p687_p13), %s603_s20, 4294965248  ;;  %p16_p1 = scmp.ge.s32.totalorder %s941_s18, 6   ;;  %s1407_s12 = smov %s880_s13 }
 0x1bf   : > { %s1408_s13 = smov %s884_s14  ;;  %s1409_s14 = smov %s953_s21 }
 0x1c0   : > { %s1410_s15 = smov %s941_s18  ;;  %18 = sbr.rel (!%p16_p1) target bundleno = 5 (0x5), region = 77 }
 0x1c7   :  { %608 = vsyncpa [#allocation3], 1 }
 0x1c8   :  { %610 = vsyncpa [#allocation3 + $0x1], 1 }
 0x1c9   :  { %611 = vsyncpa [#allocation4], 1 }
 0x1ca   :  { %613 = vsyncpa [#allocation4 + $0x1], 1 }

</bundles_post_ra>
